<compile_context>
chip_gen: v6e
topology: v6e:2x2x1
jax: 0.10.0
libtpu: 0.0.40
codegen_flags: <defaults>
</compile_context>

<pallas_src>
import functools

import jax
import jax.numpy as jnp
from jax.experimental import pallas as pl
from jax.experimental.pallas import tpu as pltpu


def _bpr_max_kernel(logit_ref, out_ref, *, bpreg: float, tm: int, n_rows: int,
                    use_diag_slice: bool, mask_rows: bool):
    i = pl.program_id(0)

    x = logit_ref[...].astype(jnp.float32)                    # (TM, B)

    # --- numerically stable softmax pieces (per-row scale, no B^2 divide) ---
    m = jnp.max(x, axis=1, keepdims=True)                     # (TM, 1)
    e = jnp.exp(x - m)                                        # (TM, B) only full-size exp
    inv_s = 1.0 / jnp.sum(e, axis=1, keepdims=True)           # (TM, 1) exact

    # --- diagonal of the (B, B) matrix restricted to this row tile ----------
    if use_diag_slice:
        # Lane-aligned (TM, TM) sub-square; column block i holds this tile's
        # diagonal.  Requires TM % 128 == 0 and B % TM == 0 (static).
        col0 = pl.multiple_of(i * tm, 128)
        xd = logit_ref[:, pl.ds(col0, tm)].astype(jnp.float32)  # (TM, TM)
        rr = jax.lax.broadcasted_iota(jnp.int32, (tm, tm), 0)
        cc = jax.lax.broadcasted_iota(jnp.int32, (tm, tm), 1)
        diag = jnp.sum(jnp.where(rr == cc, xd, 0.0), axis=1, keepdims=True)
    else:
        # Full-width masked reduce (small / ragged-B fallback path).
        local_r = jax.lax.broadcasted_iota(jnp.int32, x.shape, 0)
        col_g = jax.lax.broadcasted_iota(jnp.int32, x.shape, 1)
        diag = jnp.sum(
            jnp.where(col_g == (i * tm + local_r), x, 0.0), axis=1, keepdims=True
        )                                                      # (TM, 1)

    # --- sum_j sigmoid(diag - x_j) * softmax_j -------------------------------
    # sigmoid(diag - x_j) = e_diag / (e_diag + e_j),  e_diag = exp(diag - m).
    e_diag = jnp.exp(diag - m)                                 # (TM, 1)
    t = e_diag + e + 1e-30                 # 0/0 guard when both underflow
    r = pl.reciprocal(t, approx=True)
    r = r * (2.0 - t * r)                  # one Newton step -> ~24-bit accuracy
    s1 = inv_s * jnp.sum(e_diag * e * r, axis=1, keepdims=True)   # (TM, 1)

    # --- sum_j bpreg * x_j^2 * softmax_j -------------------------------------
    reg = bpreg * inv_s * jnp.sum(x * x * e, axis=1, keepdims=True)  # (TM, 1)

    per_row = -jnp.log(s1 + 1e-24) + reg                       # (TM, 1)

    if mask_rows:
        # Zero out padded rows (ragged B padded up to a multiple of TM).
        row_g = i * tm + jax.lax.broadcasted_iota(jnp.int32, (tm, 1), 0)
        per_row = jnp.where(row_g < n_rows, per_row, 0.0)

    partial = jnp.sum(per_row) / jnp.float32(n_rows)           # tile's share of the mean

    # Lane-dense output block; all 8x128 entries carry the same partial.
    out_ref[...] = jnp.full(out_ref.shape, partial, dtype=out_ref.dtype)


def _vmem_capacity_bytes() -> int:
    try:
        return int(pltpu.get_tpu_info().vmem_capacity_bytes)
    except Exception:
        return 64 * 1024 * 1024  # conservative (v7x per-TC) fallback


def _plan_tiling(n_rows: int, itemsize: int, vmem_capacity: int,
                 tm: int | None = None) -> tuple[int, int]:
    """Pick (row tile TM, padded row count).

    Peak VMEM per grid step ~= 2*TM*B*itemsize (double-buffered input stripe)
    + ~4*TM*B*4 (x, e and fused f32 temps); TM is bounded so this stays under
    roughly half the physical VMEM of the current TPU generation.
    """
    min_sub = max(8, 32 // itemsize)          # native sublane tile for the dtype
    if tm is not None:
        assert tm % min_sub == 0 or tm == n_rows, \
            "tm must be a multiple of the dtype's native sublane tile"
        return tm, ((n_rows + tm - 1) // tm) * tm

    bytes_per_row = n_rows * (2 * itemsize + 4 * 4)
    budget = max(min(vmem_capacity // 2, 48 * 1024 * 1024), 2 * 1024 * 1024)
    max_tm = max(min_sub, budget // max(bytes_per_row, 1))

    cands = [t for t in (2048, 1024, 512, 384, 256, 128, 96, 64, 48, 32, 24, 16, 8)
             if t % min_sub == 0 and t <= max_tm]
    if not cands:
        cands = [min_sub]

    best = None
    for t in cands:
        rows_pad = ((n_rows + t - 1) // t) * t
        n_tiles = rows_pad // t
        # Cost proxy (in "rows of work"): padded rows + ~32 rows of fixed
        # per-step overhead + a one-idle-TensorCore penalty for 1-step grids
        # (v7x has 2 TCs; "parallel" can only shard a grid with >= 2 steps).
        cost = rows_pad + 32 * n_tiles
        if n_tiles == 1 and n_rows > min_sub:
            cost += rows_pad
        score = (cost, 0 if t % 128 == 0 else 1, -t)  # prefer 128-multiples, then bigger TM
        if best is None or score < best[0]:
            best = (score, t, rows_pad)
    return best[1], best[2]


def bpr_max_loss(logit: jax.Array, bpreg: float, *, tm: int | None = None) -> jax.Array:
    """Scalar float32 loss matching BPR_MaxLoss(bpreg).forward(logit).

    The input is streamed in its native dtype (pass bf16 logits on HBM-bound
    parts like v5e) and cast to f32 in VMEM; no wrapper-side astype.
    """
    B = logit.shape[0]
    assert logit.ndim == 2 and logit.shape == (B, B), "logit must be (B, B)"

    itemsize = logit.dtype.itemsize
    vmem_cap = _vmem_capacity_bytes()
    tm, rows_pad = _plan_tiling(B, itemsize, vmem_cap, tm)
    n_tiles = rows_pad // tm
    mask_rows = rows_pad != B
    use_diag_slice = (tm % 128 == 0) and not mask_rows

    if mask_rows:
        # Pad ragged B on the row axis only (block width == full array width);
        # padded rows are masked inside the kernel so they contribute 0.
        logit = jnp.pad(logit, ((0, rows_pad - B), (0, 0)))

    kernel = functools.partial(
        _bpr_max_kernel, bpreg=float(bpreg), tm=tm, n_rows=B,
        use_diag_slice=use_diag_slice, mask_rows=mask_rows)

    cost = pl.CostEstimate(
        flops=int(14 * rows_pad * B),
        transcendentals=int(rows_pad * B + 2 * rows_pad),  # exp/elem (+ e_diag, log); rcp is approx
        bytes_accessed=int(rows_pad * B * itemsize + n_tiles * 8 * 128 * 4),
    )

    # Scoped VMEM: half the generation's capacity (64 MiB cap) but at least the
    # estimated working set; keep default 2-deep buffering (do not deepen).
    work = 2 * tm * B * itemsize + 4 * tm * B * 4 + 2 * 1024 * 1024
    vmem_limit = int(min(max(vmem_cap // 2, work), int(vmem_cap * 0.9), 96 * 1024 * 1024))

    partials = pl.pallas_call(
        kernel,
        out_shape=jax.ShapeDtypeStruct((8 * n_tiles, 128), jnp.float32),
        grid_spec=pltpu.PrefetchScalarGridSpec(
            num_scalar_prefetch=0,
            grid=(n_tiles,),
            in_specs=[pl.BlockSpec((tm, B), lambda i: (i, 0))],
            out_specs=pl.BlockSpec((8, 128), lambda i: (i, 0)),
        ),
        compiler_params=pltpu.CompilerParams(
            dimension_semantics=("parallel",),
            vmem_limit_bytes=vmem_limit,
        ),
        cost_estimate=cost,
    )(logit)

    # Each (8, 128) block broadcasts its tile's partial (already / B);
    # pick one lane per tile and add the contributions.
    return jnp.sum(partials.reshape(n_tiles, 8 * 128)[:, 0])


def _reference(logit, bpreg):
    # Pure-JAX reference mirroring the PyTorch forward.
    logit = logit.astype(jnp.float32)
    sm = jax.nn.softmax(logit, axis=1)
    diff = jnp.diag(logit)[:, None] - logit
    loss_terms = jax.nn.sigmoid(diff) * sm
    per_row = -jnp.log(jnp.sum(loss_terms, axis=1) + 1e-24) + jnp.sum(
        bpreg * logit**2 * sm, axis=1
    )
    return jnp.mean(per_row)


if __name__ == "__main__":
    key = jax.random.PRNGKey(0)
    bpreg = 1.0  # module hyperparameter, fixed in-script

    # Small (B, B) logit matrix -- single-tile path.
    B = 8
    logit = jax.random.normal(key, (B, B), dtype=jnp.float32)
    loss = jax.block_until_ready(bpr_max_loss(logit, bpreg))
    ref = jax.block_until_ready(_reference(logit, bpreg))
    assert jnp.allclose(loss, ref, atol=1e-5, rtol=1e-5), (loss, ref)

    # Multi-tile ("parallel" grid) path.
    B2 = 64
    logit2 = jax.random.normal(jax.random.PRNGKey(0), (B2, B2), dtype=jnp.float32)
    loss2 = jax.block_until_ready(bpr_max_loss(logit2, bpreg, tm=16))
    ref2 = jax.block_until_ready(_reference(logit2, bpreg))
    assert jnp.allclose(loss2, ref2, atol=1e-5, rtol=1e-5), (loss2, ref2)

    # Ragged B -> row-padded input + in-kernel row-mask path.
    B3 = 40
    logit3 = jax.random.normal(jax.random.PRNGKey(1), (B3, B3), dtype=jnp.float32)
    loss3 = jax.block_until_ready(bpr_max_loss(logit3, bpreg, tm=16))
    ref3 = jax.block_until_ready(_reference(logit3, bpreg))
    assert jnp.allclose(loss3, ref3, atol=1e-5, rtol=1e-5), (loss3, ref3)

    # TODO(synk): backward pass (custom_vjp) not implemented; forward only.
    print("KERNEL_OK")
</pallas_src>

<mosaic_0001>
module attributes {stable_mosaic.version = 11 : i64} {
  func.func @_bpr_max_kernel(%arg0: i32, %arg1: memref<8x8xf32, #tpu.memory_space<vmem>>, %arg2: memref<8x128xf32, #tpu.memory_space<vmem>>) attributes {dimension_semantics = [#tpu.dimension_semantics<parallel>], iteration_bounds = array<i64: 1>, scalar_prefetch = 0 : i64, scratch_operands = 0 : i64, tpu.core_type = #tpu.core_type<tc>, window_params = [{transform_indices = @transform_0, window_bounds = array<i64: 8, 8>}, {transform_indices = @transform_1, window_bounds = array<i64: 8, 128>}]} {
    %c0 = arith.constant 0 : index
    %c0_0 = arith.constant 0 : index
    %0 = vector.load %arg1[%c0, %c0_0] : memref<8x8xf32, #tpu.memory_space<vmem>>, vector<8x8xf32>
    %cst = arith.constant dense<0xFF800000> : vector<8xf32>
    %1 = vector.multi_reduction <maximumf>, %0, %cst [1] : vector<8x8xf32> to vector<8xf32>
    %2 = vector.shape_cast %1 : vector<8xf32> to vector<8x1xf32>
    %3 = vector.broadcast %2 : vector<8x1xf32> to vector<8x8xf32>
    %4 = arith.subf %0, %3 : vector<8x8xf32>
    %5 = math.exp %4 : vector<8x8xf32>
    %cst_1 = arith.constant dense<0.000000e+00> : vector<8xf32>
    %6 = vector.multi_reduction <add>, %5, %cst_1 [1] : vector<8x8xf32> to vector<8xf32>
    %7 = vector.shape_cast %6 : vector<8xf32> to vector<8x1xf32>
    %cst_2 = arith.constant 1.000000e+00 : f32
    %8 = vector.broadcast %cst_2 : f32 to vector<8x1xf32>
    %9 = arith.divf %8, %7 : vector<8x1xf32>
    %10 = tpu.iota {dimensions = array<i32: 0>} : vector<8x8xi32>
    %11 = tpu.iota {dimensions = array<i32: 1>} : vector<8x8xi32>
    %c8_i32 = arith.constant 8 : i32
    %12 = arith.muli %arg0, %c8_i32 : i32
    %13 = vector.broadcast %12 : i32 to vector<8x8xi32>
    %14 = arith.addi %13, %10 : vector<8x8xi32>
    %15 = arith.cmpi eq, %11, %14 : vector<8x8xi32>
    %cst_3 = arith.constant 0.000000e+00 : f32
    %16 = vector.broadcast %cst_3 : f32 to vector<8x8xf32>
    %17 = arith.select %15, %0, %16 : vector<8x8xi1>, vector<8x8xf32>
    %cst_4 = arith.constant dense<0.000000e+00> : vector<8xf32>
    %18 = vector.multi_reduction <add>, %17, %cst_4 [1] : vector<8x8xf32> to vector<8xf32>
    %19 = vector.shape_cast %18 : vector<8xf32> to vector<8x1xf32>
    %20 = arith.subf %19, %2 : vector<8x1xf32>
    %21 = math.exp %20 : vector<8x1xf32>
    %22 = vector.broadcast %21 : vector<8x1xf32> to vector<8x8xf32>
    %23 = arith.addf %22, %5 : vector<8x8xf32>
    %cst_5 = arith.constant 1.000000e-30 : f32
    %24 = vector.broadcast %cst_5 : f32 to vector<8x8xf32>
    %25 = arith.addf %23, %24 : vector<8x8xf32>
    %26 = tpu.reciprocal %25 {approx = true} : vector<8x8xf32> -> vector<8x8xf32>
    %27 = arith.mulf %25, %26 : vector<8x8xf32>
    %cst_6 = arith.constant 2.000000e+00 : f32
    %28 = vector.broadcast %cst_6 : f32 to vector<8x8xf32>
    %29 = arith.subf %28, %27 : vector<8x8xf32>
    %30 = arith.mulf %26, %29 : vector<8x8xf32>
    %31 = vector.broadcast %21 : vector<8x1xf32> to vector<8x8xf32>
    %32 = arith.mulf %31, %5 : vector<8x8xf32>
    %33 = arith.mulf %32, %30 : vector<8x8xf32>
    %cst_7 = arith.constant dense<0.000000e+00> : vector<8xf32>
    %34 = vector.multi_reduction <add>, %33, %cst_7 [1] : vector<8x8xf32> to vector<8xf32>
    %35 = vector.shape_cast %34 : vector<8xf32> to vector<8x1xf32>
    %36 = arith.mulf %9, %35 : vector<8x1xf32>
    %cst_8 = arith.constant 1.000000e+00 : f32
    %37 = vector.broadcast %cst_8 : f32 to vector<8x1xf32>
    %38 = arith.mulf %37, %9 : vector<8x1xf32>
    %39 = arith.mulf %0, %0 : vector<8x8xf32>
    %40 = arith.mulf %39, %5 : vector<8x8xf32>
    %cst_9 = arith.constant dense<0.000000e+00> : vector<8xf32>
    %41 = vector.multi_reduction <add>, %40, %cst_9 [1] : vector<8x8xf32> to vector<8xf32>
    %42 = vector.shape_cast %41 : vector<8xf32> to vector<8x1xf32>
    %43 = arith.mulf %38, %42 : vector<8x1xf32>
    %cst_10 = arith.constant 1.000000e-24 : f32
    %44 = vector.broadcast %cst_10 : f32 to vector<8x1xf32>
    %45 = arith.addf %36, %44 : vector<8x1xf32>
    %46 = math.log %45 : vector<8x1xf32>
    %cst_11 = arith.constant 0.000000e+00 : f32
    %47 = vector.broadcast %cst_11 : f32 to vector<8x1xf32>
    %48 = arith.subf %47, %46 : vector<8x1xf32>
    %49 = arith.addf %48, %43 : vector<8x1xf32>
    %50 = vector.shape_cast %49 : vector<8x1xf32> to vector<1x8x1xf32>
    %cst_12 = arith.constant dense<0.000000e+00> : vector<1xf32>
    %51 = vector.multi_reduction <add>, %50, %cst_12 [1, 2] : vector<1x8x1xf32> to vector<1xf32>
    %52 = vector.shape_cast %51 : vector<1xf32> to vector<1x1x1xf32>
    %53 = vector.extract %52[0, 0, 0] : f32 from vector<1x1x1xf32>
    %cst_13 = arith.constant 8.000000e+00 : f32
    %54 = arith.divf %53, %cst_13 : f32
    %55 = vector.broadcast %54 : f32 to vector<8x128xf32>
    %c0_14 = arith.constant 0 : index
    %c0_15 = arith.constant 0 : index
    %56 = vector.load %arg2[%c0_14, %c0_15] : memref<8x128xf32, #tpu.memory_space<vmem>>, vector<8x128xf32>
    tpu.vector_store %arg2[%c0_14, %c0_15], %55 {strides = array<i32>} : memref<8x128xf32, #tpu.memory_space<vmem>>, vector<8x128xf32>,
    return
  }
  func.func @transform_0(%arg0: i32) -> (i32, i32) {
    %c0_i32 = arith.constant 0 : i32
    %c0_i32_0 = arith.constant 0 : i32
    return %arg0, %c0_i32 : i32, i32
  }
  func.func @transform_1(%arg0: i32) -> (i32, i32) {
    %c0_i32 = arith.constant 0 : i32
    %c0_i32_0 = arith.constant 0 : i32
    return %arg0, %c0_i32 : i32, i32
  }
}

</mosaic_0001>

<bundles_post_ra>
// kernel: tpu_custom_call.1
= control target key start
LH: loop header
LB: loop body
LE: loop exit
PB: predicated region body
PF: predicated region fallthrough
CT: control target
= control target key end

     0   :  { %6 = vsyncpa [#allocation3], 0  ;;  %s184_s0 = inlined_call_operand.hbm [shape: f32[8,8], index: 0, kind: input, shape index: {}]   ;;  %s185_s1 = inlined_call_operand.hbm [shape: f32[8,128], index: 1, kind: output, shape index: {}]  }
   0x1   :  { %7 = vsyncpa [#allocation4], 0  ;;  %s161_s6 = smov [#allocation2]  }
   0x2   :  { %s14_s7 = sshll.u32 %s161_s6, 4  ;;  %s15_s7 = int_to_ptr.vmem [resolvable:$true] %s14_s7 }
   0x3   :  { %s125_s8 = scalar_lea.vmem %s15_s7, 128  ;;  %p130_p1 = scmp.lt.s32.totalorder %s15_s7, %s15_s7 }
   0x4   :  { %p126_p0 = scmp.ne.s32.totalorder %s15_s7, %s125_s8  ;;  %p131_p2 = scmp.lt.s32.totalorder %s125_s8, %s125_s8 }
   0x6   :  { %p132_p3 = por %p131_p2, %p130_p1 }
   0x8   :  { %p133_p4 = pnand %p132_p3, %p126_p0 }
   0xa   :  { %136 = shalt.err (!%p133_p4)
}
   0xb   :  { %17 = dma.hbm_to_vmem [thread:$0]  %s184_s0, 128, %s15_s7, [#allocation3]  }
   0xc   :  { %157 = dma.done.wait [#allocation3], 128  }
   0xd   :  { %158 = vsyncadd [#allocation3], 4294967168  ;;  %v34_v0 = vlaneseq  ;;  %vm22_vm0 = vcmask 64512   ;;  %v21_v3 = vld [vmem:[#allocation2] sm:$0xff]  ;;  %vm72_vm2 = vcmask 7168   ;;  %s162_s0 = smov [#allocation5]  }
   0xe   :  { %v23_v4 = vsel %vm22_vm0, %v21_v3, -inf  ;;  %v61_v13 = vmul.f32 %v21_v3, %v21_v3  ;;  %s94_s11 = sshll.u32 %s162_s0, 4  ;;  %s95_s11 = int_to_ptr.vmem [resolvable:$true] %s94_s11 }
   0xf   :  { %v35_v1 = vshrl.u32 %v34_v0, 7  ;;  %v37_v2 = vand.u32 127, %v34_v0  ;;  %24 = vmax.xlane.f32.xlu0 %v23_v4  ;;  %s137_s14 = scalar_lea.vmem %s95_s11, 128  ;;  %p142_p6 = scmp.lt.s32.totalorder %s95_s11, %s95_s11 }
  0x10   :  { %p138_p5 = scmp.ne.s32.totalorder %s95_s11, %s137_s14  ;;  %p143_p7 = scmp.lt.s32.totalorder %s137_s14, %s137_s14 }
  0x11   :  { %vm41_vm1 = vcmp.eq.s32.totalorder %v37_v2, %v35_v1 }
  0x12   :  { %v42_v5 = vsel %vm41_vm1, %v21_v3, 0.0  ;;  %p144_p8 = por %p143_p7, %p142_p6 }
  0x13   :  { %v43_v6 = vsel %vm22_vm0, %v42_v5, 0.0 }
  0x14   :  { %44 = vadd.xlane.f32.xlu0 %v43_v6  ;;  %p145_p9 = pnand %p144_p8, %p138_p5 }
  0x98   :  { %v25_v7 = vpop.xlane.xlu0 %24 }
  0x99   :  { %v26_v8 = vsub.f32 %v21_v3, %v25_v7 }
  0x9b   :  { %v27_v9 = vmul.f32 1.442695, %v26_v8 }
  0x9d   :  { %v45_v10 = vpop.xlane.xlu0 %44  ;;  %107 = vpow2.f32 %v27_v9 }
  0x9e   :  { %v46_v11 = vsub.f32 %v45_v10, %v25_v7 }
  0xa0   :  { %v47_v12 = vmul.f32 1.442695, %v46_v11 }
  0xa2   :  { %109 = vpow2.f32 %v47_v12 }
  0xaa   :  { %v108_v14 = vpop.eup %107 }
  0xab   :  { %v29_v15 = vsel %vm22_vm0, %v108_v14, 0.0  ;;  %v62_v16 = vmul.f32 %v108_v14, %v61_v13 }
  0xac   :  { %30 = vadd.xlane.f32.xlu1 %v29_v15 }
  0xad   :  { %v63_v17 = vsel %vm22_vm0, %v62_v16, 0.0 }
  0xae   :  { %64 = vadd.xlane.f32.xlu0 %v63_v17 }
  0xaf   :  { %v110_v18 = vpop.eup %109 }
  0xb0   :  { %v49_v19 = vadd.f32 %v110_v18, %v108_v14  ;;  %v55_v25 = vmul.f32 %v110_v18, %v108_v14 }
  0xb2   :  { %v50_v20 = vadd.f32 1e-30, %v49_v19 }
  0xb4   :  { %111 = vrcp.f32 %v50_v20 }
  0xc1   :  { %v112_v21 = vpop.eup %111 }
  0xc2   :  { %v52_v22 = vmul.f32 %v112_v21, %v50_v20 }
  0xc4   :  { %v53_v23 = vsub.f32 2.0, %v52_v22 }
  0xc6   :  { %v54_v24 = vmul.f32 %v112_v21, %v53_v23 }
  0xc8   :  { %v56_v26 = vmul.f32 %v55_v25, %v54_v24 }
  0xca   :  { %v57_v27 = vsel %vm22_vm0, %v56_v26, 0.0 }
  0xcb   :  { %58 = vadd.xlane.f32.xlu1 %v57_v27 }
 0x135   :  { %v31_v28 = vpop.xlane.xlu1 %30 }
 0x136   :  { %113 = vrcp.f32 %v31_v28 }
 0x137   :  { %v65_v35 = vpop.xlane.xlu0 %64 }
 0x143   :  { %v114_v29 = vpop.eup %113 }
 0x144   :  { %v66_v36 = vmul.f32 %v114_v29, %v65_v35 }
 0x154   :  { %v59_v30 = vpop.xlane.xlu1 %58 }
 0x155   :  { %v60_v31 = vmul.f32 %v114_v29, %v59_v30 }
 0x157   :  { %v67_v32 = vadd.f32 1e-24, %v60_v31 }
 0x159   :  { %115 = vlog2.f32 %v67_v32 }
 0x166   :  { %v116_v33 = vpop.eup %115 }
 0x167   :  { %v69_v34 = vmul.f32 0.6931472, %v116_v33 }
 0x169   :  { %v70_v37 = vsub.f32 0.0, %v69_v34 }
 0x16b   :  { %v71_v38 = vadd.f32 %v70_v37, %v66_v36 }
 0x16d   :  { %v73_v39 = vsel %vm72_vm2, %v71_v38, 0.0 }
 0x16e   :  { %74 = vadd.xlane.f32.xlu1 %v73_v39 }
 0x1f7   :  { %v75_v40 = vpop.xlane.xlu1 %74 }
 0x1f8   :  { %v76_v41 = vrot.slane %v75_v40, 4 }
 0x1fa   :  { %v77_v42 = vadd.f32 %v76_v41, %v75_v40 }
 0x1fc   :  { %v78_v43 = vrot.slane %v77_v42, 2 }
 0x1fe   :  { %v79_v44 = vadd.f32 %v78_v43, %v77_v42 }
 0x200   :  { %v80_v45 = vrot.slane %v79_v44, 1 }
 0x202   :  { %v81_v46 = vadd.f32 %v80_v45, %v79_v44 }
 0x204   :  { %103 = vpush %v81_v46 }
 0x235   :  { %s104_s12 = spop %103 }
 0x236   :  { %s85_s13 = smul.f32 0.125, %s104_s12 }
 0x238   :  { %v86_v47 = vstv %s85_s13 }
 0x239   :  { %87 = vst [vmem:[#allocation5] sm:$0xff] %v86_v47 }
 0x23a   :  { %148 = shalt.err (!%p145_p9)
}
 0x23b   :  { %97 = dma.vmem_to_hbm [thread:$0]  %s95_s11, 128, %s185_s1, [#allocation4]  }
 0x23c   :  { %159 = dma.done.wait [#allocation4], 128  }
 0x23d   :  { %160 = vsyncadd [#allocation4], 4294967168 }
 0x23e   :  { %101 = vsyncpa [#allocation3], 1 }
 0x23f   :  { %102 = vsyncpa [#allocation4], 1 }

</bundles_post_ra>
